<compile_context>
chip_gen: v6e
topology: v6e:2x2x1
jax: 0.10.0
libtpu: 0.0.40
codegen_flags: <defaults>
</compile_context>

<pallas_src>
import functools

import jax
import jax.numpy as jnp
from jax.experimental import pallas as pl
from jax.experimental.pallas import tpu as pltpu

_LANE = 128
_SUBLANE = 8


def _round_up(n, m):
    return ((n + m - 1) // m) * m


def _pad_to(a, shape):
    pads = [(0, t - s) for s, t in zip(a.shape, shape)]
    if any(p[1] for p in pads):
        return jnp.pad(a, pads)
    return a


def dqn_kernel(x_ref, w1_ref, b1_ref, w2_ref, b2_ref, w3_ref, b3_ref, o_ref):
    # fc1 + relu  (MXU matmul, f32 accumulate; bias broadcasts over batch tile)
    h1 = jnp.dot(x_ref[...], w1_ref[...], preferred_element_type=jnp.float32)
    h1 = jnp.maximum(h1 + b1_ref[...], 0.0)

    # fc2 + relu  (single downcast right at the matmul input; bias/relu in f32)
    h2 = jnp.dot(h1.astype(w2_ref.dtype), w2_ref[...],
                 preferred_element_type=jnp.float32)
    h2 = jnp.maximum(h2 + b2_ref[...], 0.0)

    # fc3 (no activation); output lanes are padded to 128 -> unmasked stores
    h3 = jnp.dot(h2.astype(w3_ref.dtype), w3_ref[...],
                 preferred_element_type=jnp.float32)
    o_ref[...] = (h3 + b3_ref[...]).astype(o_ref.dtype)


@functools.partial(jax.jit, static_argnames=("tile_b", "use_bf16"))
def dqn_forward(x, params, *, tile_b=512, use_bf16=True):
    """x: (B, input_size) float32.  params: dict with w1,b1,w2,b2,w3,b3.

    Returns (B, output_size) float32.
    """
    w1, b1 = params["w1"], params["b1"]
    w2, b2 = params["w2"], params["b2"]
    w3, b3 = params["w3"], params["b3"]

    B, in_size = x.shape
    h1_size = w1.shape[1]                      # 128 (already lane aligned)
    h2_size = w2.shape[1]                      # 64
    out_size = w3.shape[1]

    # Lane-pad narrow widths (fc2: 64 -> 128, fc3 output: out_size -> 128).
    h2_p = max(_round_up(h2_size, _LANE), _LANE)
    out_p = max(_round_up(out_size, _LANE), _LANE)

    w2p = _pad_to(w2, (h1_size, h2_p))
    b2p = _pad_to(b2, (1, h2_p))
    w3p = _pad_to(w3, (h2_p, out_p))
    b3p = _pad_to(b3, (1, out_p))

    # MXU operand dtype: bf16 on v6e/v7x (f32 accumulation inside the kernel).
    cdt = jnp.bfloat16 if use_bf16 else jnp.float32
    xk = x.astype(cdt)
    w1k, w2k, w3k = w1.astype(cdt), w2p.astype(cdt), w3p.astype(cdt)
    b1k, b2k, b3k = (b1.astype(jnp.float32), b2p.astype(jnp.float32),
                     b3p.astype(jnp.float32))

    # Batch tiling: tile must be a multiple of 8 sublanes; pad B up to a
    # multiple of the tile so the grid is exact.
    tb = min(int(tile_b), _round_up(B, _SUBLANE))
    tb = _round_up(tb, _SUBLANE)
    b_p = _round_up(B, tb)
    xk = _pad_to(xk, (b_p, in_size))
    grid = (pl.cdiv(b_p, tb),)

    # Weights/biases: same block every grid step -> stay resident in VMEM.
    def resident(a):
        return pl.BlockSpec(a.shape, lambda i: (0,) * a.ndim)

    flops = 2 * b_p * (in_size * h1_size + h1_size * h2_p + h2_p * out_p)
    bytes_accessed = (xk.size * xk.dtype.itemsize
                      + b_p * out_p * 4
                      + sum(a.size * a.dtype.itemsize
                            for a in (w1k, b1k, w2k, b2k, w3k, b3k)))

    out = pl.pallas_call(
        dqn_kernel,
        out_shape=jax.ShapeDtypeStruct((b_p, out_p), jnp.float32),
        grid=grid,
        in_specs=[
            pl.BlockSpec((tb, in_size), lambda i: (i, 0)),   # x: tiled on batch
            resident(w1k), resident(b1k),
            resident(w2k), resident(b2k),
            resident(w3k), resident(b3k),
        ],
        out_specs=pl.BlockSpec((tb, out_p), lambda i: (i, 0)),
        compiler_params=pltpu.CompilerParams(
            dimension_semantics=("parallel",),
            vmem_limit_bytes=32 * 1024 * 1024,
        ),
        cost_estimate=pl.CostEstimate(
            flops=flops, transcendentals=0, bytes_accessed=bytes_accessed),
    )(xk, w1k, b1k, w2k, b2k, w3k, b3k)

    # Strip batch / lane padding (fused into the same jitted program).
    return out[:B, :out_size]


def init_dqn_params(key, input_size, output_size):
    """PyTorch nn.Linear-style init: U(-1/sqrt(fan_in), 1/sqrt(fan_in)) for
    weights and biases.  Weights stored as (in_features, out_features)."""
    sizes = [(input_size, 128), (128, 64), (64, output_size)]
    params = {}
    for i, (fan_in, fan_out) in enumerate(sizes, start=1):
        key, kw, kb = jax.random.split(key, 3)
        bound = 1.0 / (fan_in ** 0.5)
        params[f"w{i}"] = jax.random.uniform(
            kw, (fan_in, fan_out), jnp.float32, -bound, bound)
        params[f"b{i}"] = jax.random.uniform(
            kb, (1, fan_out), jnp.float32, -bound, bound)
    return params


def _ref_forward(x, params, dtype):
    """Plain-JAX reference with the same operand dtype / f32 accumulation."""
    w1, b1 = params["w1"].astype(dtype), params["b1"]
    w2, b2 = params["w2"].astype(dtype), params["b2"]
    w3, b3 = params["w3"].astype(dtype), params["b3"]
    h1 = jnp.maximum(
        jnp.dot(x.astype(dtype), w1, preferred_element_type=jnp.float32) + b1, 0.0)
    h2 = jnp.maximum(
        jnp.dot(h1.astype(dtype), w2, preferred_element_type=jnp.float32) + b2, 0.0)
    return jnp.dot(h2.astype(dtype), w3, preferred_element_type=jnp.float32) + b3


if __name__ == "__main__":
    key = jax.random.PRNGKey(0)
    input_size = 16      # e.g. state-vector size for the football simulation
    output_size = 4      # e.g. number of discrete actions
    batch = 8

    kx, kp, kx2 = jax.random.split(key, 3)
    x = jax.random.normal(kx, (batch, input_size), jnp.float32)
    params = init_dqn_params(kp, input_size, output_size)

    # 1) Small batch, all-f32 path: tight check against f32 reference.
    out_f32 = jax.block_until_ready(dqn_forward(x, params, use_bf16=False))
    ref_f32 = _ref_forward(x, params, jnp.float32)
    assert out_f32.shape == (batch, output_size)
    assert jnp.allclose(out_f32, ref_f32, atol=1e-5, rtol=1e-5)

    # 2) Small batch, bf16-operand / f32-accumulate path (v6e/v7x fast path).
    out_bf16 = jax.block_until_ready(dqn_forward(x, params, use_bf16=True))
    ref_bf16 = _ref_forward(x, params, jnp.bfloat16)
    assert jnp.allclose(out_bf16, ref_bf16, atol=1e-3, rtol=1e-3)

    # 3) Non-divisible batch to exercise the multi-tile grid + padding path.
    xb = jax.random.normal(kx2, (260, input_size), jnp.float32)
    out_big = jax.block_until_ready(
        dqn_forward(xb, params, tile_b=128, use_bf16=False))
    ref_big = _ref_forward(xb, params, jnp.float32)
    assert out_big.shape == (260, output_size)
    assert jnp.allclose(out_big, ref_big, atol=1e-5, rtol=1e-5)

    print("KERNEL_OK")
</pallas_src>

<mosaic_0001>
module attributes {stable_mosaic.version = 11 : i64} {
  func.func @dqn_kernel(%arg0: i32, %arg1: memref<8x16xf32, #tpu.memory_space<vmem>>, %arg2: memref<16x128xf32, #tpu.memory_space<vmem>>, %arg3: memref<1x128xf32, #tpu.memory_space<vmem>>, %arg4: memref<128x128xf32, #tpu.memory_space<vmem>>, %arg5: memref<1x128xf32, #tpu.memory_space<vmem>>, %arg6: memref<128x128xf32, #tpu.memory_space<vmem>>, %arg7: memref<1x128xf32, #tpu.memory_space<vmem>>, %arg8: memref<8x128xf32, #tpu.memory_space<vmem>>) attributes {dimension_semantics = [#tpu.dimension_semantics<parallel>], iteration_bounds = array<i64: 1>, scalar_prefetch = 0 : i64, scratch_operands = 0 : i64, tpu.core_type = #tpu.core_type<tc>, window_params = [{transform_indices = @transform_0, window_bounds = array<i64: 8, 16>}, {pipeline_mode = #tpu.pipeline_mode<synchronous>, transform_indices = @transform_1, window_bounds = array<i64: 16, 128>}, {pipeline_mode = #tpu.pipeline_mode<synchronous>, transform_indices = @transform_2, window_bounds = array<i64: 1, 128>}, {pipeline_mode = #tpu.pipeline_mode<synchronous>, transform_indices = @transform_3, window_bounds = array<i64: 128, 128>}, {pipeline_mode = #tpu.pipeline_mode<synchronous>, transform_indices = @transform_4, window_bounds = array<i64: 1, 128>}, {pipeline_mode = #tpu.pipeline_mode<synchronous>, transform_indices = @transform_5, window_bounds = array<i64: 128, 128>}, {pipeline_mode = #tpu.pipeline_mode<synchronous>, transform_indices = @transform_6, window_bounds = array<i64: 1, 128>}, {transform_indices = @transform_7, window_bounds = array<i64: 8, 128>}]} {
    %c0 = arith.constant 0 : index
    %c0_0 = arith.constant 0 : index
    %0 = vector.load %arg1[%c0, %c0_0] : memref<8x16xf32, #tpu.memory_space<vmem>>, vector<8x16xf32>
    %c0_1 = arith.constant 0 : index
    %c0_2 = arith.constant 0 : index
    %1 = vector.load %arg2[%c0_1, %c0_2] : memref<16x128xf32, #tpu.memory_space<vmem>>, vector<16x128xf32>
    %cst = arith.constant dense<0.000000e+00> : vector<8x128xf32>
    %2 = tpu.matmul %0, %1, %cst {dimension_numbers = #tpu.dot_dimension_numbers<[1], [0], [0], [1], [0, 0, 1, 1], [], []>} : vector<8x16xf32>, vector<16x128xf32>, vector<8x128xf32> -> vector<8x128xf32>
    %c0_3 = arith.constant 0 : index
    %c0_4 = arith.constant 0 : index
    %3 = vector.load %arg3[%c0_3, %c0_4] : memref<1x128xf32, #tpu.memory_space<vmem>>, vector<1x128xf32>
    %4 = vector.broadcast %3 : vector<1x128xf32> to vector<8x128xf32>
    %5 = arith.addf %2, %4 : vector<8x128xf32>
    %cst_5 = arith.constant 0.000000e+00 : f32
    %6 = vector.broadcast %cst_5 : f32 to vector<8x128xf32>
    %7 = arith.maximumf %5, %6 : vector<8x128xf32>
    %c0_6 = arith.constant 0 : index
    %c0_7 = arith.constant 0 : index
    %8 = vector.load %arg4[%c0_6, %c0_7] : memref<128x128xf32, #tpu.memory_space<vmem>>, vector<128x128xf32>
    %cst_8 = arith.constant dense<0.000000e+00> : vector<8x128xf32>
    %9 = tpu.matmul %7, %8, %cst_8 {dimension_numbers = #tpu.dot_dimension_numbers<[1], [0], [0], [1], [0, 0, 1, 1], [], []>} : vector<8x128xf32>, vector<128x128xf32>, vector<8x128xf32> -> vector<8x128xf32>
    %c0_9 = arith.constant 0 : index
    %c0_10 = arith.constant 0 : index
    %10 = vector.load %arg5[%c0_9, %c0_10] : memref<1x128xf32, #tpu.memory_space<vmem>>, vector<1x128xf32>
    %11 = vector.broadcast %10 : vector<1x128xf32> to vector<8x128xf32>
    %12 = arith.addf %9, %11 : vector<8x128xf32>
    %cst_11 = arith.constant 0.000000e+00 : f32
    %13 = vector.broadcast %cst_11 : f32 to vector<8x128xf32>
    %14 = arith.maximumf %12, %13 : vector<8x128xf32>
    %c0_12 = arith.constant 0 : index
    %c0_13 = arith.constant 0 : index
    %15 = vector.load %arg6[%c0_12, %c0_13] : memref<128x128xf32, #tpu.memory_space<vmem>>, vector<128x128xf32>
    %cst_14 = arith.constant dense<0.000000e+00> : vector<8x128xf32>
    %16 = tpu.matmul %14, %15, %cst_14 {dimension_numbers = #tpu.dot_dimension_numbers<[1], [0], [0], [1], [0, 0, 1, 1], [], []>} : vector<8x128xf32>, vector<128x128xf32>, vector<8x128xf32> -> vector<8x128xf32>
    %c0_15 = arith.constant 0 : index
    %c0_16 = arith.constant 0 : index
    %17 = vector.load %arg7[%c0_15, %c0_16] : memref<1x128xf32, #tpu.memory_space<vmem>>, vector<1x128xf32>
    %18 = vector.broadcast %17 : vector<1x128xf32> to vector<8x128xf32>
    %19 = arith.addf %16, %18 : vector<8x128xf32>
    %c0_17 = arith.constant 0 : index
    %c0_18 = arith.constant 0 : index
    %20 = vector.load %arg8[%c0_17, %c0_18] : memref<8x128xf32, #tpu.memory_space<vmem>>, vector<8x128xf32>
    tpu.vector_store %arg8[%c0_17, %c0_18], %19 {strides = array<i32>} : memref<8x128xf32, #tpu.memory_space<vmem>>, vector<8x128xf32>,
    return
  }
  func.func @transform_0(%arg0: i32) -> (i32, i32) {
    %c0_i32 = arith.constant 0 : i32
    %c0_i32_0 = arith.constant 0 : i32
    return %arg0, %c0_i32 : i32, i32
  }
  func.func @transform_1(%arg0: i32) -> (i32, i32) {
    %c0_i32 = arith.constant 0 : i32
    %c0_i32_0 = arith.constant 0 : i32
    %c0_i32_1 = arith.constant 0 : i32
    return %c0_i32, %c0_i32_0 : i32, i32
  }
  func.func @transform_2(%arg0: i32) -> (i32, i32) {
    %c0_i32 = arith.constant 0 : i32
    %c0_i32_0 = arith.constant 0 : i32
    %c0_i32_1 = arith.constant 0 : i32
    return %c0_i32, %c0_i32_0 : i32, i32
  }
  func.func @transform_3(%arg0: i32) -> (i32, i32) {
    %c0_i32 = arith.constant 0 : i32
    %c0_i32_0 = arith.constant 0 : i32
    %c0_i32_1 = arith.constant 0 : i32
    return %c0_i32, %c0_i32_0 : i32, i32
  }
  func.func @transform_4(%arg0: i32) -> (i32, i32) {
    %c0_i32 = arith.constant 0 : i32
    %c0_i32_0 = arith.constant 0 : i32
    %c0_i32_1 = arith.constant 0 : i32
    return %c0_i32, %c0_i32_0 : i32, i32
  }
  func.func @transform_5(%arg0: i32) -> (i32, i32) {
    %c0_i32 = arith.constant 0 : i32
    %c0_i32_0 = arith.constant 0 : i32
    %c0_i32_1 = arith.constant 0 : i32
    return %c0_i32, %c0_i32_0 : i32, i32
  }
  func.func @transform_6(%arg0: i32) -> (i32, i32) {
    %c0_i32 = arith.constant 0 : i32
    %c0_i32_0 = arith.constant 0 : i32
    %c0_i32_1 = arith.constant 0 : i32
    return %c0_i32, %c0_i32_0 : i32, i32
  }
  func.func @transform_7(%arg0: i32) -> (i32, i32) {
    %c0_i32 = arith.constant 0 : i32
    %c0_i32_0 = arith.constant 0 : i32
    return %arg0, %c0_i32 : i32, i32
  }
}

</mosaic_0001>

<bundles_post_ra>
// kernel: dqn_forward.1
= control target key start
LH: loop header
LB: loop body
LE: loop exit
PB: predicated region body
PF: predicated region fallthrough
CT: control target
= control target key end

     0   :  { %v423_v0 = vmov 0.0   ;;  %vm424_vm0 = vmmov 0   ;;  %vm36_vm1 = vcmask 130048   ;;  %s622_s1 = inlined_call_operand.vmem [shape: f32[16,128], index: 1, kind: input, shape index: {}]   ;;  %s623_s0 = inlined_call_operand.vmem [shape: f32[8,16], index: 0, kind: input, shape index: {}]   ;;  %s624_s3 = inlined_call_operand.vmem [shape: f32[128,128], index: 3, kind: input, shape index: {}]   ;;  %s625_s5 = inlined_call_operand.vmem [shape: f32[128,128], index: 5, kind: input, shape index: {}]   ;;  %s626_s2 = inlined_call_operand.vmem [shape: f32[1,128], index: 2, kind: input, shape index: {}]   ;;  %s627_s4 = inlined_call_operand.vmem [shape: f32[1,128], index: 4, kind: input, shape index: {}]   ;;  %s628_s6 = inlined_call_operand.vmem [shape: f32[1,128], index: 6, kind: input, shape index: {}]   ;;  %s629_s7 = inlined_call_operand.vmem [shape: f32[8,128], index: 7, kind: output, shape index: {}]  }
   0x1   :  { %344 = vmatprep.subr.mxu0 %v423_v0  ;;  %v28_v1 = vld [vmem:[%s622_s1 + $0x8] sm:$0xff]  ;;  %v27_v2 = vld [vmem:[%s622_s1] sm:$0xff]  ;;  %348 = vmatprep.mubr.msk.f32.mxu0 %vm424_vm0, %v423_v0  ;;  %v126_v4 = vld [vmem:[%s624_s3 + $0x78] sm:$0xff] }
   0x2   :  { %345 = vmatpush3.msra.mxu0 %v28_v1  ;;  %v26_v3 = vld [vmem:[%s623_s0] sm:$0xff]  ;;  %351 = vmatprep.subr.mxu1 %v423_v0  ;;  %v125_v5 = vld [vmem:[%s624_s3 + $0x70] sm:$0xff]  ;;  %v124_v6 = vld [vmem:[%s624_s3 + $0x68] sm:$0xff] }
   0x3   :  { %346 = vmatprep.subr.mxu0 %v423_v0  ;;  %352 = vmatpush3.msra.mxu1 %v126_v4  ;;  %v123_v7 = vld [vmem:[%s624_s3 + $0x60] sm:$0xff]  ;;  %v122_v8 = vld [vmem:[%s624_s3 + $0x58] sm:$0xff]  ;;  %v121_v9 = vld [vmem:[%s624_s3 + $0x50] sm:$0xff] }
   0x4   :  { %347 = vmatpush3.msra.mxu0 %v27_v2  ;;  %353 = vmatprep.subr.mxu1 %v423_v0  ;;  %v120_v10 = vld [vmem:[%s624_s3 + $0x48] sm:$0xff]  ;;  %v119_v11 = vld [vmem:[%s624_s3 + $0x40] sm:$0xff]  ;;  %v118_v12 = vld [vmem:[%s624_s3 + $0x38] sm:$0xff] }
   0x5   :  { %349 = vmatmul.mubr.msk.f32.vlgmr.msra.gmra.mxu0 %vm36_vm1, %v26_v3  ;;  %354 = vmatpush3.msra.mxu1 %v125_v5  ;;  %v117_v13 = vld [vmem:[%s624_s3 + $0x30] sm:$0xff]  ;;  %v116_v14 = vld [vmem:[%s624_s3 + $0x28] sm:$0xff]  ;;  %v115_v15 = vld [vmem:[%s624_s3 + $0x20] sm:$0xff] }
   0x6   :  { %355 = vmatprep.subr.mxu1 %v423_v0  ;;  %383 = vmatprep.mubr.msk.f32.mxu1 %vm424_vm0, %v423_v0  ;;  %v114_v16 = vld [vmem:[%s624_s3 + $0x18] sm:$0xff]  ;;  %v113_v17 = vld [vmem:[%s624_s3 + $0x10] sm:$0xff]  ;;  %v112_v18 = vld [vmem:[%s624_s3 + $0x8] sm:$0xff] }
   0x7   :  { %356 = vmatpush3.msra.mxu1 %v124_v6  ;;  %386 = vmatprep.subr.mxu0 %v423_v0  ;;  %v111_v19 = vld [vmem:[%s624_s3] sm:$0xff]  ;;  %v220_v20 = vld [vmem:[%s625_s5 + $0x78] sm:$0xff]  ;;  %v219_v21 = vld [vmem:[%s625_s5 + $0x70] sm:$0xff] }
   0x8   :  { %357 = vmatprep.subr.mxu1 %v423_v0  ;;  %418 = vmatprep.mubr.msk.f32.mxu0 %vm424_vm0, %v423_v0  ;;  %v218_v22 = vld [vmem:[%s625_s5 + $0x68] sm:$0xff]  ;;  %v217_v23 = vld [vmem:[%s625_s5 + $0x60] sm:$0xff]  ;;  %v216_v24 = vld [vmem:[%s625_s5 + $0x58] sm:$0xff] }
   0x9   :  { %358 = vmatpush3.msra.mxu1 %v123_v7  ;;  %387 = vmatpush3.msra.mxu0 %v220_v20  ;;  %v215_v25 = vld [vmem:[%s625_s5 + $0x50] sm:$0xff]  ;;  %v214_v26 = vld [vmem:[%s625_s5 + $0x48] sm:$0xff]  ;;  %v213_v27 = vld [vmem:[%s625_s5 + $0x40] sm:$0xff] }
   0xa   :  { %359 = vmatprep.subr.mxu1 %v423_v0  ;;  %388 = vmatprep.subr.mxu0 %v423_v0  ;;  %v212_v28 = vld [vmem:[%s625_s5 + $0x38] sm:$0xff]  ;;  %v211_v29 = vld [vmem:[%s625_s5 + $0x30] sm:$0xff]  ;;  %v210_v30 = vld [vmem:[%s625_s5 + $0x28] sm:$0xff] }
   0xb   :  { %360 = vmatpush3.msra.mxu1 %v122_v8  ;;  %389 = vmatpush3.msra.mxu0 %v219_v21  ;;  %v209_v31 = vld [vmem:[%s625_s5 + $0x20] sm:$0xff]  ;;  %v208_v32 = vld [vmem:[%s625_s5 + $0x18] sm:$0xff]  ;;  %v207_v38 = vld [vmem:[%s625_s5 + $0x10] sm:$0xff] }
   0xc   :  { %361 = vmatprep.subr.mxu1 %v423_v0  ;;  %390 = vmatprep.subr.mxu0 %v423_v0  ;;  %v303_v33 = vld [vmem:[%s626_s2] ss:$0 sm:$0xff]  ;;  %v206_v39 = vld [vmem:[%s625_s5 + $0x8] sm:$0xff] }
   0xd   :  { %362 = vmatpush3.msra.mxu1 %v121_v9  ;;  %391 = vmatpush3.msra.mxu0 %v218_v22  ;;  %v205_v40 = vld [vmem:[%s625_s5] sm:$0xff] }
   0xe   :  { %363 = vmatprep.subr.mxu1 %v423_v0  ;;  %392 = vmatprep.subr.mxu0 %v423_v0  ;;  %v305_v41 = vld [vmem:[%s627_s4] ss:$0 sm:$0xff] }
   0xf   :  { %364 = vmatpush3.msra.mxu1 %v120_v10  ;;  %393 = vmatpush3.msra.mxu0 %v217_v23  ;;  %v306_v46 = vld [vmem:[%s628_s6] ss:$0 sm:$0xff] }
  0x10   :  { %365 = vmatprep.subr.mxu1 %v423_v0  ;;  %394 = vmatprep.subr.mxu0 %v423_v0 }
  0x11   :  { %366 = vmatpush3.msra.mxu1 %v119_v11  ;;  %395 = vmatpush3.msra.mxu0 %v216_v24 }
  0x12   :  { %367 = vmatprep.subr.mxu1 %v423_v0  ;;  %396 = vmatprep.subr.mxu0 %v423_v0 }
  0x13   :  { %368 = vmatpush3.msra.mxu1 %v118_v12  ;;  %397 = vmatpush3.msra.mxu0 %v215_v25 }
  0x14   :  { %369 = vmatprep.subr.mxu1 %v423_v0  ;;  %398 = vmatprep.subr.mxu0 %v423_v0 }
  0x15   :  { %370 = vmatpush3.msra.mxu1 %v117_v13  ;;  %399 = vmatpush3.msra.mxu0 %v214_v26 }
  0x16   :  { %371 = vmatprep.subr.mxu1 %v423_v0  ;;  %400 = vmatprep.subr.mxu0 %v423_v0 }
  0x17   :  { %372 = vmatpush3.msra.mxu1 %v116_v14  ;;  %401 = vmatpush3.msra.mxu0 %v213_v27 }
  0x18   :  { %373 = vmatprep.subr.mxu1 %v423_v0  ;;  %402 = vmatprep.subr.mxu0 %v423_v0 }
  0x19   :  { %374 = vmatpush3.msra.mxu1 %v115_v15  ;;  %403 = vmatpush3.msra.mxu0 %v212_v28 }
  0x1a   :  { %375 = vmatprep.subr.mxu1 %v423_v0  ;;  %404 = vmatprep.subr.mxu0 %v423_v0 }
  0x1b   :  { %376 = vmatpush3.msra.mxu1 %v114_v16  ;;  %405 = vmatpush3.msra.mxu0 %v211_v29 }
  0x1c   :  { %377 = vmatprep.subr.mxu1 %v423_v0  ;;  %406 = vmatprep.subr.mxu0 %v423_v0 }
  0x1d   :  { %378 = vmatpush3.msra.mxu1 %v113_v17  ;;  %407 = vmatpush3.msra.mxu0 %v210_v30 }
  0x1e   :  { %379 = vmatprep.subr.mxu1 %v423_v0  ;;  %408 = vmatprep.subr.mxu0 %v423_v0 }
  0x1f   :  { %380 = vmatpush3.msra.mxu1 %v112_v18  ;;  %409 = vmatpush3.msra.mxu0 %v209_v31 }
  0x20   :  { %381 = vmatprep.subr.mxu1 %v423_v0  ;;  %410 = vmatprep.subr.mxu0 %v423_v0 }
  0x21   :  { %382 = vmatpush3.msra.mxu1 %v111_v19  ;;  %411 = vmatpush3.msra.mxu0 %v208_v32 }
  0x22   :  { %412 = vmatprep.subr.mxu0 %v423_v0 }
  0x23   :  { %413 = vmatpush3.msra.mxu0 %v207_v38 }
  0x24   :  { %414 = vmatprep.subr.mxu0 %v423_v0 }
  0x25   :  { %415 = vmatpush3.msra.mxu0 %v206_v39 }
  0x26   :  { %416 = vmatprep.subr.mxu0 %v423_v0 }
  0x27   :  { %417 = vmatpush3.msra.mxu0 %v205_v40 }
  0xc5   :  { %v106_v34 = vpop.f32.mrf.mxu0 }
  0xc6   :  { %v107_v35 = vadd.f32 %v303_v33, %v106_v34 }
  0xc7   :  { %v350_v36 = vpop.f32.mrf.mxu0 }
  0xc8   :  { %v110_v37 = vmax.f32 %v107_v35, 0.0 }
  0xca   :  { %384 = vmatmul.mubr.f32.vlgmr.msra.gmra.mxu1 %v110_v37 }
 0x18a   :  { %v200_v42 = vpop.f32.mrf.mxu1 }
 0x18b   :  { %v201_v43 = vadd.f32 %v305_v41, %v200_v42 }
 0x18c   :  { %v385_v44 = vpop.f32.mrf.mxu1 }
 0x18d   :  { %v204_v45 = vmax.f32 %v201_v43, 0.0 }
 0x18f   :  { %419 = vmatmul.mubr.f32.vlgmr.msra.gmra.mxu0 %v204_v45 }
 0x24f   :  { %v294_v47 = vpop.f32.mrf.mxu0 }
 0x250   :  { %v295_v48 = vadd.f32 %v306_v46, %v294_v47 }
 0x251   :  { %v420_v49 = vpop.f32.mrf.mxu0 }
 0x252   :  { %298 = vst [vmem:[%s629_s7] sm:$0xff] %v295_v48 }

</bundles_post_ra>
